<compile_context>
chip_gen: v5e
topology: v5e:2x2
jax: 0.10.0
libtpu: 0.0.40
codegen_flags: <defaults>
</compile_context>

<pallas_src>
import jax
import jax.numpy as jnp
from jax.experimental import pallas as pl
from jax.experimental.pallas import tpu as pltpu

_SUBLANES = 8  # f32 sublane count; batch is padded to a multiple of this.


def actor_kernel(x_ref, fc1w_ref, fc1b_ref, wih_ref, whh_ref, lstmb_ref,
                 aw_ref, ab_ref, h0_ref, c0_ref,
                 prob_ref, hout_ref, cout_ref):
    TB = x_ref.shape[0]               # T * Bp rows, time-major
    H2 = whh_ref.shape[0]
    Bp = h0_ref.shape[0]              # padded batch (full sublane)
    T = TB // Bp
    H3 = 3 * H2

    # Hoisted recurrent weight: stays resident in vregs for all T steps.
    whh = whh_ref[...]                                               # (H2, 4*H2)

    # ---- time-parallel input projection: one MXU pass over all T*Bp rows ----
    x1 = jnp.maximum(
        jnp.dot(x_ref[...], fc1w_ref[...], preferred_element_type=jnp.float32)
        + fc1b_ref[...], 0.0)                                        # (T*Bp, H1)
    xg = (jnp.dot(x1, wih_ref[...], preferred_element_type=jnp.float32)
          + lstmb_ref[...])                                          # (T*Bp, 4*H2), lives in vregs

    # ---- LSTM recurrence; gate column order is (i, f, o, g) after param prep ----
    h = h0_ref[...]                                                  # (Bp, H2)
    c = c0_ref[...]                                                  # (Bp, H2)
    hs = []
    for t in range(T):   # static full unroll; only h @ W_hh sits on the serial path
        gates = xg[t * Bp:(t + 1) * Bp, :] + jnp.dot(
            h, whh, preferred_element_type=jnp.float32)              # (Bp, 4*H2)
        sig = jax.nn.sigmoid(gates[:, :H3])    # i|f|o in one contiguous EUP pass
        g = jnp.tanh(gates[:, H3:])
        i = sig[:, 0:H2]
        f = sig[:, H2:2 * H2]
        o = sig[:, 2 * H2:H3]
        c = f * c + i * g
        h = o * jnp.tanh(c)
        hs.append(h)                           # kept in vregs; no VMEM round trip
    hout_ref[...] = h
    cout_ref[...] = c

    # ---- action head + softmax over the action dimension ----
    hs_all = jnp.concatenate(hs, axis=0)                             # (T*Bp, H2), vreg concat
    logits = (jnp.dot(hs_all, aw_ref[...], preferred_element_type=jnp.float32)
              + ab_ref[...])                                         # (T*Bp, A)
    m = jnp.max(logits, axis=-1, keepdims=True)
    e = jnp.exp(logits - m)
    s = jnp.sum(e, axis=-1, keepdims=True)
    # Exact reciprocal: epilogue is off the critical path and rows stay exactly normalized.
    prob_ref[...] = e / s


def prepare_actor_params(params):
    """One-time parameter prep (call once, outside the hot path).

    Permutes LSTM gate columns (i, f, g, o) -> (i, f, o, g) so the kernel runs
    sigmoid on one contiguous 3*H2 lane block and tanh on the trailing H2 lanes
    (2 transcendental passes per step instead of 4)."""
    fc1w, fc1b, wih, whh, lstmb, aw, ab = params
    H2 = whh.shape[0]

    def perm(w):
        return jnp.concatenate(
            [w[:, :2 * H2], w[:, 3 * H2:4 * H2], w[:, 2 * H2:3 * H2]], axis=1)

    return (fc1w, fc1b, perm(wih), perm(whh), perm(lstmb), aw, ab)


@jax.jit
def actor_forward(prepared_params, x, hidden):
    """x: (B, T, state_dim); hidden: (h0, c0) each (1, B, H2) like PyTorch.
    prepared_params must come from prepare_actor_params (gate columns permuted).
    Jitted so the layout plumbing around the pallas_call is a single dispatch."""
    fc1w, fc1b, wih_p, whh_p, lstmb_p, aw, ab = prepared_params
    B, T, D = x.shape
    H2 = whh_p.shape[0]
    A = aw.shape[1]
    h0, c0 = hidden

    # Pad batch to a full f32 sublane and flatten to a time-major 2D layout so the
    # kernel never touches 3D tensors (reshapes materialize VMEM copies) and every
    # per-step tensor in the recurrence is an unmasked (8, lanes) vreg.
    Bp = ((B + _SUBLANES - 1) // _SUBLANES) * _SUBLANES
    x_tm = jnp.transpose(x, (1, 0, 2))                               # (T, B, D)
    x_tm = jnp.pad(x_tm, ((0, 0), (0, Bp - B), (0, 0)))              # (T, Bp, D)
    x_tm = x_tm.reshape(T * Bp, D)
    h0p = jnp.pad(h0[0], ((0, Bp - B), (0, 0)))                      # (Bp, H2)
    c0p = jnp.pad(c0[0], ((0, Bp - B), (0, 0)))                      # (Bp, H2)

    vmem = pl.BlockSpec(memory_space=pltpu.MemorySpace.VMEM)
    out_shapes = (
        jax.ShapeDtypeStruct((T * Bp, A), jnp.float32),   # prob (time-major rows)
        jax.ShapeDtypeStruct((Bp, H2), jnp.float32),      # h_n
        jax.ShapeDtypeStruct((Bp, H2), jnp.float32),      # c_n
    )

    # Gridless single-core call: at B=2/T=8 the whole problem fits in a few vregs.
    # TODO(synk): when B/T grow, add a batch grid with dimension_semantics=("parallel",)
    # (uses v7x's second TensorCore / v6e megacore) and consider a weight-stationary
    # recurrence via pltpu.matmul_push_rhs / matmul_acc_lhs / matmul_pop.
    prob_tm, hn, cn = pl.pallas_call(
        actor_kernel,
        out_shape=out_shapes,
        in_specs=[vmem] * 10,
        out_specs=(vmem, vmem, vmem),
    )(x_tm, fc1w, fc1b, wih_p, whh_p, lstmb_p, aw, ab, h0p, c0p)

    prob = jnp.transpose(prob_tm.reshape(T, Bp, A)[:, :B, :], (1, 0, 2))   # (B, T, A)
    return prob, (hn[:B][None], cn[:B][None])


def actor_reference(params, x, hidden):
    """Pure-JAX reference mirroring the PyTorch forward (original gate order)."""
    fc1w, fc1b, wih, whh, lstmb, aw, ab = params
    H2 = whh.shape[0]
    h0, c0 = hidden
    x1 = jax.nn.relu(x @ fc1w + fc1b)                   # (B, T, H1)

    def step(carry, xt):
        h, c = carry
        gates = xt @ wih + h @ whh + lstmb
        i = jax.nn.sigmoid(gates[:, 0 * H2:1 * H2])
        f = jax.nn.sigmoid(gates[:, 1 * H2:2 * H2])
        g = jnp.tanh(gates[:, 2 * H2:3 * H2])
        o = jax.nn.sigmoid(gates[:, 3 * H2:4 * H2])
        c = f * c + i * g
        h = o * jnp.tanh(c)
        return (h, c), h

    (hn, cn), hs = jax.lax.scan(step, (h0[0], c0[0]), jnp.transpose(x1, (1, 0, 2)))
    hs = jnp.transpose(hs, (1, 0, 2))                   # (B, T, H2)
    logits = hs @ aw + ab
    prob = jax.nn.softmax(logits, axis=2)
    return prob, (hn[None], cn[None])


def make_params(key, state_dim, action_dim, hidden_size=(64, 32)):
    """Deterministic synthetic init mirroring Actor.init() shapes/schemes."""
    H1, H2 = hidden_size
    k1, k2, k3, k4 = jax.random.split(key, 4)
    # fc1: kaiming-normal (relu), bias 0.  Stored transposed: (state_dim, H1).
    fc1w = jax.random.normal(k1, (state_dim, H1), jnp.float32) * jnp.sqrt(2.0 / state_dim)
    fc1b = jnp.zeros((1, H1), jnp.float32)
    # LSTM: orthogonal weights, biases ih=1 and hh=1 -> combined bias = 2.
    orth = jax.nn.initializers.orthogonal()
    wih = orth(k2, (4 * H2, H1), jnp.float32).T         # (H1, 4*H2), gate order i,f,g,o
    whh = orth(k3, (4 * H2, H2), jnp.float32).T         # (H2, 4*H2)
    lstmb = jnp.full((1, 4 * H2), 2.0, jnp.float32)
    # action_head: kaiming-normal, bias 0.  Stored transposed: (H2, action_dim).
    aw = jax.random.normal(k4, (H2, action_dim), jnp.float32) * jnp.sqrt(2.0 / H2)
    ab = jnp.zeros((1, action_dim), jnp.float32)
    return (fc1w, fc1b, wih, whh, lstmb, aw, ab)


if __name__ == "__main__":
    state_dim, action_dim = 16, 4
    hidden_size = (64, 32)
    B, T = 2, 8

    key = jax.random.PRNGKey(0)
    kp, kx = jax.random.split(key)
    params = make_params(kp, state_dim, action_dim, hidden_size)
    prepared = prepare_actor_params(params)   # one-time gate-column permutation

    x = jax.random.normal(kx, (B, T, state_dim), jnp.float32)
    h0 = jnp.zeros((1, B, hidden_size[1]), jnp.float32)
    c0 = jnp.zeros((1, B, hidden_size[1]), jnp.float32)

    prob, (hn, cn) = actor_forward(prepared, x, (h0, c0))
    jax.block_until_ready((prob, hn, cn))

    prob_ref, (hn_ref, cn_ref) = actor_reference(params, x, (h0, c0))
    assert prob.shape == (B, T, action_dim)
    assert hn.shape == (1, B, hidden_size[1]) and cn.shape == (1, B, hidden_size[1])
    assert jnp.allclose(prob, prob_ref, atol=1e-4, rtol=1e-4)
    assert jnp.allclose(hn, hn_ref, atol=1e-5, rtol=1e-5)
    assert jnp.allclose(cn, cn_ref, atol=1e-5, rtol=1e-5)

    print("KERNEL_OK")
</pallas_src>

<mosaic_0001>
module attributes {stable_mosaic.version = 11 : i64} {
  func.func @actor_kernel(%arg0: memref<64x16xf32, #tpu.memory_space<vmem>>, %arg1: memref<16x64xf32, #tpu.memory_space<vmem>>, %arg2: memref<1x64xf32, #tpu.memory_space<vmem>>, %arg3: memref<64x128xf32, #tpu.memory_space<vmem>>, %arg4: memref<32x128xf32, #tpu.memory_space<vmem>>, %arg5: memref<1x128xf32, #tpu.memory_space<vmem>>, %arg6: memref<32x4xf32, #tpu.memory_space<vmem>>, %arg7: memref<1x4xf32, #tpu.memory_space<vmem>>, %arg8: memref<8x32xf32, #tpu.memory_space<vmem>>, %arg9: memref<8x32xf32, #tpu.memory_space<vmem>>, %arg10: memref<64x4xf32, #tpu.memory_space<vmem>>, %arg11: memref<8x32xf32, #tpu.memory_space<vmem>>, %arg12: memref<8x32xf32, #tpu.memory_space<vmem>>) attributes {dimension_semantics = [], scalar_prefetch = 0 : i64, scratch_operands = 0 : i64, tpu.core_type = #tpu.core_type<tc>} {
    %c0 = arith.constant 0 : index
    %c0_0 = arith.constant 0 : index
    %0 = vector.load %arg4[%c0, %c0_0] : memref<32x128xf32, #tpu.memory_space<vmem>>, vector<32x128xf32>
    %c0_1 = arith.constant 0 : index
    %c0_2 = arith.constant 0 : index
    %1 = vector.load %arg0[%c0_1, %c0_2] : memref<64x16xf32, #tpu.memory_space<vmem>>, vector<64x16xf32>
    %c0_3 = arith.constant 0 : index
    %c0_4 = arith.constant 0 : index
    %2 = vector.load %arg1[%c0_3, %c0_4] : memref<16x64xf32, #tpu.memory_space<vmem>>, vector<16x64xf32>
    %cst = arith.constant dense<0.000000e+00> : vector<64x64xf32>
    %3 = tpu.matmul %1, %2, %cst {dimension_numbers = #tpu.dot_dimension_numbers<[1], [0], [0], [1], [0, 0, 1, 1], [], []>} : vector<64x16xf32>, vector<16x64xf32>, vector<64x64xf32> -> vector<64x64xf32>
    %c0_5 = arith.constant 0 : index
    %c0_6 = arith.constant 0 : index
    %4 = vector.load %arg2[%c0_5, %c0_6] : memref<1x64xf32, #tpu.memory_space<vmem>>, vector<1x64xf32>
    %5 = vector.broadcast %4 : vector<1x64xf32> to vector<64x64xf32>
    %6 = arith.addf %3, %5 : vector<64x64xf32>
    %cst_7 = arith.constant 0.000000e+00 : f32
    %7 = vector.broadcast %cst_7 : f32 to vector<64x64xf32>
    %8 = arith.maximumf %6, %7 : vector<64x64xf32>
    %c0_8 = arith.constant 0 : index
    %c0_9 = arith.constant 0 : index
    %9 = vector.load %arg3[%c0_8, %c0_9] : memref<64x128xf32, #tpu.memory_space<vmem>>, vector<64x128xf32>
    %cst_10 = arith.constant dense<0.000000e+00> : vector<64x128xf32>
    %10 = tpu.matmul %8, %9, %cst_10 {dimension_numbers = #tpu.dot_dimension_numbers<[1], [0], [0], [1], [0, 0, 1, 1], [], []>} : vector<64x64xf32>, vector<64x128xf32>, vector<64x128xf32> -> vector<64x128xf32>
    %c0_11 = arith.constant 0 : index
    %c0_12 = arith.constant 0 : index
    %11 = vector.load %arg5[%c0_11, %c0_12] : memref<1x128xf32, #tpu.memory_space<vmem>>, vector<1x128xf32>
    %12 = vector.broadcast %11 : vector<1x128xf32> to vector<64x128xf32>
    %13 = arith.addf %10, %12 : vector<64x128xf32>
    %c0_13 = arith.constant 0 : index
    %c0_14 = arith.constant 0 : index
    %14 = vector.load %arg8[%c0_13, %c0_14] : memref<8x32xf32, #tpu.memory_space<vmem>>, vector<8x32xf32>
    %c0_15 = arith.constant 0 : index
    %c0_16 = arith.constant 0 : index
    %15 = vector.load %arg9[%c0_15, %c0_16] : memref<8x32xf32, #tpu.memory_space<vmem>>, vector<8x32xf32>
    %16 = vector.extract_strided_slice %13 {offsets = [0, 0], sizes = [8, 128], strides = [1, 1]} : vector<64x128xf32> to vector<8x128xf32>
    %cst_17 = arith.constant dense<0.000000e+00> : vector<8x128xf32>
    %17 = tpu.matmul %14, %0, %cst_17 {dimension_numbers = #tpu.dot_dimension_numbers<[1], [0], [0], [1], [0, 0, 1, 1], [], []>} : vector<8x32xf32>, vector<32x128xf32>, vector<8x128xf32> -> vector<8x128xf32>
    %18 = arith.addf %16, %17 : vector<8x128xf32>
    %19 = vector.extract_strided_slice %18 {offsets = [0, 0], sizes = [8, 96], strides = [1, 1]} : vector<8x128xf32> to vector<8x96xf32>
    %20 = arith.negf %19 : vector<8x96xf32>
    %21 = math.exp %20 : vector<8x96xf32>
    %cst_18 = arith.constant 1.000000e+00 : f32
    %22 = vector.broadcast %cst_18 : f32 to vector<8x96xf32>
    %23 = arith.addf %22, %21 : vector<8x96xf32>
    %24 = arith.divf %22, %23 : vector<8x96xf32>
    %25 = vector.extract_strided_slice %18 {offsets = [0, 96], sizes = [8, 32], strides = [1, 1]} : vector<8x128xf32> to vector<8x32xf32>
    %26 = math.tanh %25 : vector<8x32xf32>
    %27 = vector.extract_strided_slice %24 {offsets = [0, 0], sizes = [8, 32], strides = [1, 1]} : vector<8x96xf32> to vector<8x32xf32>
    %28 = vector.extract_strided_slice %24 {offsets = [0, 32], sizes = [8, 32], strides = [1, 1]} : vector<8x96xf32> to vector<8x32xf32>
    %29 = vector.extract_strided_slice %24 {offsets = [0, 64], sizes = [8, 32], strides = [1, 1]} : vector<8x96xf32> to vector<8x32xf32>
    %30 = arith.mulf %28, %15 : vector<8x32xf32>
    %31 = arith.mulf %27, %26 : vector<8x32xf32>
    %32 = arith.addf %30, %31 : vector<8x32xf32>
    %33 = math.tanh %32 : vector<8x32xf32>
    %34 = arith.mulf %29, %33 : vector<8x32xf32>
    %35 = vector.extract_strided_slice %13 {offsets = [8, 0], sizes = [8, 128], strides = [1, 1]} : vector<64x128xf32> to vector<8x128xf32>
    %cst_19 = arith.constant dense<0.000000e+00> : vector<8x128xf32>
    %36 = tpu.matmul %34, %0, %cst_19 {dimension_numbers = #tpu.dot_dimension_numbers<[1], [0], [0], [1], [0, 0, 1, 1], [], []>} : vector<8x32xf32>, vector<32x128xf32>, vector<8x128xf32> -> vector<8x128xf32>
    %37 = arith.addf %35, %36 : vector<8x128xf32>
    %38 = vector.extract_strided_slice %37 {offsets = [0, 0], sizes = [8, 96], strides = [1, 1]} : vector<8x128xf32> to vector<8x96xf32>
    %39 = arith.negf %38 : vector<8x96xf32>
    %40 = math.exp %39 : vector<8x96xf32>
    %cst_20 = arith.constant 1.000000e+00 : f32
    %41 = vector.broadcast %cst_20 : f32 to vector<8x96xf32>
    %42 = arith.addf %41, %40 : vector<8x96xf32>
    %43 = arith.divf %41, %42 : vector<8x96xf32>
    %44 = vector.extract_strided_slice %37 {offsets = [0, 96], sizes = [8, 32], strides = [1, 1]} : vector<8x128xf32> to vector<8x32xf32>
    %45 = math.tanh %44 : vector<8x32xf32>
    %46 = vector.extract_strided_slice %43 {offsets = [0, 0], sizes = [8, 32], strides = [1, 1]} : vector<8x96xf32> to vector<8x32xf32>
    %47 = vector.extract_strided_slice %43 {offsets = [0, 32], sizes = [8, 32], strides = [1, 1]} : vector<8x96xf32> to vector<8x32xf32>
    %48 = vector.extract_strided_slice %43 {offsets = [0, 64], sizes = [8, 32], strides = [1, 1]} : vector<8x96xf32> to vector<8x32xf32>
    %49 = arith.mulf %47, %32 : vector<8x32xf32>
    %50 = arith.mulf %46, %45 : vector<8x32xf32>
    %51 = arith.addf %49, %50 : vector<8x32xf32>
    %52 = math.tanh %51 : vector<8x32xf32>
    %53 = arith.mulf %48, %52 : vector<8x32xf32>
    %54 = vector.extract_strided_slice %13 {offsets = [16, 0], sizes = [8, 128], strides = [1, 1]} : vector<64x128xf32> to vector<8x128xf32>
    %cst_21 = arith.constant dense<0.000000e+00> : vector<8x128xf32>
    %55 = tpu.matmul %53, %0, %cst_21 {dimension_numbers = #tpu.dot_dimension_numbers<[1], [0], [0], [1], [0, 0, 1, 1], [], []>} : vector<8x32xf32>, vector<32x128xf32>, vector<8x128xf32> -> vector<8x128xf32>
    %56 = arith.addf %54, %55 : vector<8x128xf32>
    %57 = vector.extract_strided_slice %56 {offsets = [0, 0], sizes = [8, 96], strides = [1, 1]} : vector<8x128xf32> to vector<8x96xf32>
    %58 = arith.negf %57 : vector<8x96xf32>
    %59 = math.exp %58 : vector<8x96xf32>
    %cst_22 = arith.constant 1.000000e+00 : f32
    %60 = vector.broadcast %cst_22 : f32 to vector<8x96xf32>
    %61 = arith.addf %60, %59 : vector<8x96xf32>
    %62 = arith.divf %60, %61 : vector<8x96xf32>
    %63 = vector.extract_strided_slice %56 {offsets = [0, 96], sizes = [8, 32], strides = [1, 1]} : vector<8x128xf32> to vector<8x32xf32>
    %64 = math.tanh %63 : vector<8x32xf32>
    %65 = vector.extract_strided_slice %62 {offsets = [0, 0], sizes = [8, 32], strides = [1, 1]} : vector<8x96xf32> to vector<8x32xf32>
    %66 = vector.extract_strided_slice %62 {offsets = [0, 32], sizes = [8, 32], strides = [1, 1]} : vector<8x96xf32> to vector<8x32xf32>
    %67 = vector.extract_strided_slice %62 {offsets = [0, 64], sizes = [8, 32], strides = [1, 1]} : vector<8x96xf32> to vector<8x32xf32>
    %68 = arith.mulf %66, %51 : vector<8x32xf32>
    %69 = arith.mulf %65, %64 : vector<8x32xf32>
    %70 = arith.addf %68, %69 : vector<8x32xf32>
    %71 = math.tanh %70 : vector<8x32xf32>
    %72 = arith.mulf %67, %71 : vector<8x32xf32>
    %73 = vector.extract_strided_slice %13 {offsets = [24, 0], sizes = [8, 128], strides = [1, 1]} : vector<64x128xf32> to vector<8x128xf32>
    %cst_23 = arith.constant dense<0.000000e+00> : vector<8x128xf32>
    %74 = tpu.matmul %72, %0, %cst_23 {dimension_numbers = #tpu.dot_dimension_numbers<[1], [0], [0], [1], [0, 0, 1, 1], [], []>} : vector<8x32xf32>, vector<32x128xf32>, vector<8x128xf32> -> vector<8x128xf32>
    %75 = arith.addf %73, %74 : vector<8x128xf32>
    %76 = vector.extract_strided_slice %75 {offsets = [0, 0], sizes = [8, 96], strides = [1, 1]} : vector<8x128xf32> to vector<8x96xf32>
    %77 = arith.negf %76 : vector<8x96xf32>
    %78 = math.exp %77 : vector<8x96xf32>
    %cst_24 = arith.constant 1.000000e+00 : f32
    %79 = vector.broadcast %cst_24 : f32 to vector<8x96xf32>
    %80 = arith.addf %79, %78 : vector<8x96xf32>
    %81 = arith.divf %79, %80 : vector<8x96xf32>
    %82 = vector.extract_strided_slice %75 {offsets = [0, 96], sizes = [8, 32], strides = [1, 1]} : vector<8x128xf32> to vector<8x32xf32>
    %83 = math.tanh %82 : vector<8x32xf32>
    %84 = vector.extract_strided_slice %81 {offsets = [0, 0], sizes = [8, 32], strides = [1, 1]} : vector<8x96xf32> to vector<8x32xf32>
    %85 = vector.extract_strided_slice %81 {offsets = [0, 32], sizes = [8, 32], strides = [1, 1]} : vector<8x96xf32> to vector<8x32xf32>
    %86 = vector.extract_strided_slice %81 {offsets = [0, 64], sizes = [8, 32], strides = [1, 1]} : vector<8x96xf32> to vector<8x32xf32>
    %87 = arith.mulf %85, %70 : vector<8x32xf32>
    %88 = arith.mulf %84, %83 : vector<8x32xf32>
    %89 = arith.addf %87, %88 : vector<8x32xf32>
    %90 = math.tanh %89 : vector<8x32xf32>
    %91 = arith.mulf %86, %90 : vector<8x32xf32>
    %92 = vector.extract_strided_slice %13 {offsets = [32, 0], sizes = [8, 128], strides = [1, 1]} : vector<64x128xf32> to vector<8x128xf32>
    %cst_25 = arith.constant dense<0.000000e+00> : vector<8x128xf32>
    %93 = tpu.matmul %91, %0, %cst_25 {dimension_numbers = #tpu.dot_dimension_numbers<[1], [0], [0], [1], [0, 0, 1, 1], [], []>} : vector<8x32xf32>, vector<32x128xf32>, vector<8x128xf32> -> vector<8x128xf32>
    %94 = arith.addf %92, %93 : vector<8x128xf32>
    %95 = vector.extract_strided_slice %94 {offsets = [0, 0], sizes = [8, 96], strides = [1, 1]} : vector<8x128xf32> to vector<8x96xf32>
    %96 = arith.negf %95 : vector<8x96xf32>
    %97 = math.exp %96 : vector<8x96xf32>
    %cst_26 = arith.constant 1.000000e+00 : f32
    %98 = vector.broadcast %cst_26 : f32 to vector<8x96xf32>
    %99 = arith.addf %98, %97 : vector<8x96xf32>
    %100 = arith.divf %98, %99 : vector<8x96xf32>
    %101 = vector.extract_strided_slice %94 {offsets = [0, 96], sizes = [8, 32], strides = [1, 1]} : vector<8x128xf32> to vector<8x32xf32>
    %102 = math.tanh %101 : vector<8x32xf32>
    %103 = vector.extract_strided_slice %100 {offsets = [0, 0], sizes = [8, 32], strides = [1, 1]} : vector<8x96xf32> to vector<8x32xf32>
    %104 = vector.extract_strided_slice %100 {offsets = [0, 32], sizes = [8, 32], strides = [1, 1]} : vector<8x96xf32> to vector<8x32xf32>
    %105 = vector.extract_strided_slice %100 {offsets = [0, 64], sizes = [8, 32], strides = [1, 1]} : vector<8x96xf32> to vector<8x32xf32>
    %106 = arith.mulf %104, %89 : vector<8x32xf32>
    %107 = arith.mulf %103, %102 : vector<8x32xf32>
    %108 = arith.addf %106, %107 : vector<8x32xf32>
    %109 = math.tanh %108 : vector<8x32xf32>
    %110 = arith.mulf %105, %109 : vector<8x32xf32>
    %111 = vector.extract_strided_slice %13 {offsets = [40, 0], sizes = [8, 128], strides = [1, 1]} : vector<64x128xf32> to vector<8x128xf32>
    %cst_27 = arith.constant dense<0.000000e+00> : vector<8x128xf32>
    %112 = tpu.matmul %110, %0, %cst_27 {dimension_numbers = #tpu.dot_dimension_numbers<[1], [0], [0], [1], [0, 0, 1, 1], [], []>} : vector<8x32xf32>, vector<32x128xf32>, vector<8x128xf32> -> vector<8x128xf32>
    %113 = arith.addf %111, %112 : vector<8x128xf32>
    %114 = vector.extract_strided_slice %113 {offsets = [0, 0], sizes = [8, 96], strides = [1, 1]} : vector<8x128xf32> to vector<8x96xf32>
    %115 = arith.negf %114 : vector<8x96xf32>
    %116 = math.exp %115 : vector<8x96xf32>
    %cst_28 = arith.constant 1.000000e+00 : f32
    %117 = vector.broadcast %cst_28 : f32 to vector<8x96xf32>
    %118 = arith.addf %117, %116 : vector<8x96xf32>
    %119 = arith.divf %117, %118 : vector<8x96xf32>
    %120 = vector.extract_strided_slice %113 {offsets = [0, 96], sizes = [8, 32], strides = [1, 1]} : vector<8x128xf32> to vector<8x32xf32>
    %121 = math.tanh %120 : vector<8x32xf32>
    %122 = vector.extract_strided_slice %119 {offsets = [0, 0], sizes = [8, 32], strides = [1, 1]} : vector<8x96xf32> to vector<8x32xf32>
    %123 = vector.extract_strided_slice %119 {offsets = [0, 32], sizes = [8, 32], strides = [1, 1]} : vector<8x96xf32> to vector<8x32xf32>
    %124 = vector.extract_strided_slice %119 {offsets = [0, 64], sizes = [8, 32], strides = [1, 1]} : vector<8x96xf32> to vector<8x32xf32>
    %125 = arith.mulf %123, %108 : vector<8x32xf32>
    %126 = arith.mulf %122, %121 : vector<8x32xf32>
    %127 = arith.addf %125, %126 : vector<8x32xf32>
    %128 = math.tanh %127 : vector<8x32xf32>
    %129 = arith.mulf %124, %128 : vector<8x32xf32>
    %130 = vector.extract_strided_slice %13 {offsets = [48, 0], sizes = [8, 128], strides = [1, 1]} : vector<64x128xf32> to vector<8x128xf32>
    %cst_29 = arith.constant dense<0.000000e+00> : vector<8x128xf32>
    %131 = tpu.matmul %129, %0, %cst_29 {dimension_numbers = #tpu.dot_dimension_numbers<[1], [0], [0], [1], [0, 0, 1, 1], [], []>} : vector<8x32xf32>, vector<32x128xf32>, vector<8x128xf32> -> vector<8x128xf32>
    %132 = arith.addf %130, %131 : vector<8x128xf32>
    %133 = vector.extract_strided_slice %132 {offsets = [0, 0], sizes = [8, 96], strides = [1, 1]} : vector<8x128xf32> to vector<8x96xf32>
    %134 = arith.negf %133 : vector<8x96xf32>
    %135 = math.exp %134 : vector<8x96xf32>
    %cst_30 = arith.constant 1.000000e+00 : f32
    %136 = vector.broadcast %cst_30 : f32 to vector<8x96xf32>
    %137 = arith.addf %136, %135 : vector<8x96xf32>
    %138 = arith.divf %136, %137 : vector<8x96xf32>
    %139 = vector.extract_strided_slice %132 {offsets = [0, 96], sizes = [8, 32], strides = [1, 1]} : vector<8x128xf32> to vector<8x32xf32>
    %140 = math.tanh %139 : vector<8x32xf32>
    %141 = vector.extract_strided_slice %138 {offsets = [0, 0], sizes = [8, 32], strides = [1, 1]} : vector<8x96xf32> to vector<8x32xf32>
    %142 = vector.extract_strided_slice %138 {offsets = [0, 32], sizes = [8, 32], strides = [1, 1]} : vector<8x96xf32> to vector<8x32xf32>
    %143 = vector.extract_strided_slice %138 {offsets = [0, 64], sizes = [8, 32], strides = [1, 1]} : vector<8x96xf32> to vector<8x32xf32>
    %144 = arith.mulf %142, %127 : vector<8x32xf32>
    %145 = arith.mulf %141, %140 : vector<8x32xf32>
    %146 = arith.addf %144, %145 : vector<8x32xf32>
    %147 = math.tanh %146 : vector<8x32xf32>
    %148 = arith.mulf %143, %147 : vector<8x32xf32>
    %149 = vector.extract_strided_slice %13 {offsets = [56, 0], sizes = [8, 128], strides = [1, 1]} : vector<64x128xf32> to vector<8x128xf32>
    %cst_31 = arith.constant dense<0.000000e+00> : vector<8x128xf32>
    %150 = tpu.matmul %148, %0, %cst_31 {dimension_numbers = #tpu.dot_dimension_numbers<[1], [0], [0], [1], [0, 0, 1, 1], [], []>} : vector<8x32xf32>, vector<32x128xf32>, vector<8x128xf32> -> vector<8x128xf32>
    %151 = arith.addf %149, %150 : vector<8x128xf32>
    %152 = vector.extract_strided_slice %151 {offsets = [0, 0], sizes = [8, 96], strides = [1, 1]} : vector<8x128xf32> to vector<8x96xf32>
    %153 = arith.negf %152 : vector<8x96xf32>
    %154 = math.exp %153 : vector<8x96xf32>
    %cst_32 = arith.constant 1.000000e+00 : f32
    %155 = vector.broadcast %cst_32 : f32 to vector<8x96xf32>
    %156 = arith.addf %155, %154 : vector<8x96xf32>
    %157 = arith.divf %155, %156 : vector<8x96xf32>
    %158 = vector.extract_strided_slice %151 {offsets = [0, 96], sizes = [8, 32], strides = [1, 1]} : vector<8x128xf32> to vector<8x32xf32>
    %159 = math.tanh %158 : vector<8x32xf32>
    %160 = vector.extract_strided_slice %157 {offsets = [0, 0], sizes = [8, 32], strides = [1, 1]} : vector<8x96xf32> to vector<8x32xf32>
    %161 = vector.extract_strided_slice %157 {offsets = [0, 32], sizes = [8, 32], strides = [1, 1]} : vector<8x96xf32> to vector<8x32xf32>
    %162 = vector.extract_strided_slice %157 {offsets = [0, 64], sizes = [8, 32], strides = [1, 1]} : vector<8x96xf32> to vector<8x32xf32>
    %163 = arith.mulf %161, %146 : vector<8x32xf32>
    %164 = arith.mulf %160, %159 : vector<8x32xf32>
    %165 = arith.addf %163, %164 : vector<8x32xf32>
    %166 = math.tanh %165 : vector<8x32xf32>
    %167 = arith.mulf %162, %166 : vector<8x32xf32>
    %c0_33 = arith.constant 0 : index
    %c0_34 = arith.constant 0 : index
    %168 = vector.load %arg11[%c0_33, %c0_34] : memref<8x32xf32, #tpu.memory_space<vmem>>, vector<8x32xf32>
    tpu.vector_store %arg11[%c0_33, %c0_34], %167 {strides = array<i32>} : memref<8x32xf32, #tpu.memory_space<vmem>>, vector<8x32xf32>,
    %c0_35 = arith.constant 0 : index
    %c0_36 = arith.constant 0 : index
    %169 = vector.load %arg12[%c0_35, %c0_36] : memref<8x32xf32, #tpu.memory_space<vmem>>, vector<8x32xf32>
    tpu.vector_store %arg12[%c0_35, %c0_36], %165 {strides = array<i32>} : memref<8x32xf32, #tpu.memory_space<vmem>>, vector<8x32xf32>,
    %170 = tpu.concatenate %34, %53, %72, %91, %110, %129, %148, %167 in 0 : vector<8x32xf32>, vector<8x32xf32>, vector<8x32xf32>, vector<8x32xf32>, vector<8x32xf32>, vector<8x32xf32>, vector<8x32xf32>, vector<8x32xf32> -> vector<64x32xf32>
    %c0_37 = arith.constant 0 : index
    %c0_38 = arith.constant 0 : index
    %171 = vector.load %arg6[%c0_37, %c0_38] : memref<32x4xf32, #tpu.memory_space<vmem>>, vector<32x4xf32>
    %cst_39 = arith.constant dense<0.000000e+00> : vector<64x4xf32>
    %172 = tpu.matmul %170, %171, %cst_39 {dimension_numbers = #tpu.dot_dimension_numbers<[1], [0], [0], [1], [0, 0, 1, 1], [], []>} : vector<64x32xf32>, vector<32x4xf32>, vector<64x4xf32> -> vector<64x4xf32>
    %c0_40 = arith.constant 0 : index
    %c0_41 = arith.constant 0 : index
    %173 = vector.load %arg7[%c0_40, %c0_41] : memref<1x4xf32, #tpu.memory_space<vmem>>, vector<1x4xf32>
    %174 = vector.broadcast %173 : vector<1x4xf32> to vector<64x4xf32>
    %175 = arith.addf %172, %174 : vector<64x4xf32>
    %cst_42 = arith.constant dense<0xFF800000> : vector<64xf32>
    %176 = vector.multi_reduction <maximumf>, %175, %cst_42 [1] : vector<64x4xf32> to vector<64xf32>
    %177 = vector.shape_cast %176 : vector<64xf32> to vector<64x1xf32>
    %178 = vector.broadcast %177 : vector<64x1xf32> to vector<64x4xf32>
    %179 = arith.subf %175, %178 : vector<64x4xf32>
    %180 = math.exp %179 : vector<64x4xf32>
    %cst_43 = arith.constant dense<0.000000e+00> : vector<64xf32>
    %181 = vector.multi_reduction <add>, %180, %cst_43 [1] : vector<64x4xf32> to vector<64xf32>
    %182 = vector.shape_cast %181 : vector<64xf32> to vector<64x1xf32>
    %183 = vector.broadcast %182 : vector<64x1xf32> to vector<64x4xf32>
    %184 = arith.divf %180, %183 : vector<64x4xf32>
    %c0_44 = arith.constant 0 : index
    %c0_45 = arith.constant 0 : index
    %185 = vector.load %arg10[%c0_44, %c0_45] : memref<64x4xf32, #tpu.memory_space<vmem>>, vector<64x4xf32>
    tpu.vector_store %arg10[%c0_44, %c0_45], %184 {strides = array<i32>} : memref<64x4xf32, #tpu.memory_space<vmem>>, vector<64x4xf32>,
    return
  }
}

</mosaic_0001>

<bundles_post_ra>
// kernel: actor_forward.1
= control target key start
LH: loop header
LB: loop body
LE: loop exit
PB: predicated region body
PF: predicated region fallthrough
CT: control target
= control target key end

     0   :  { %vm56_vm0 = vcmask 130048   ;;  %vm210_vm1 = vcmask 261120   ;;  %vm142_vm2 = vcmask 523264   ;;  %s1138_s18 = smov 64   ;;  %s1139_s20 = smov 96   ;;  %s1552_s1 = inlined_call_operand.vmem [shape: f32[16,64], index: 1, kind: input, shape index: {}]   ;;  %s1553_s0 = inlined_call_operand.vmem [shape: f32[64,16], index: 0, kind: input, shape index: {}]   ;;  %s1554_s3 = inlined_call_operand.vmem [shape: f32[64,128], index: 3, kind: input, shape index: {}]   ;;  %s1555_s4 = inlined_call_operand.vmem [shape: f32[32,128], index: 4, kind: input, shape index: {}]   ;;  %s1556_s2 = inlined_call_operand.vmem [shape: f32[1,64], index: 2, kind: input, shape index: {}]   ;;  %s1557_s5 = inlined_call_operand.vmem [shape: f32[1,128], index: 5, kind: input, shape index: {}]   ;;  %s1558_s8 = inlined_call_operand.vmem [shape: f32[8,32], index: 8, kind: input, shape index: {}]   ;;  %s1559_s9 = inlined_call_operand.vmem [shape: f32[8,32], index: 9, kind: input, shape index: {}]   ;;  %s1560_s6 = inlined_call_operand.vmem [shape: f32[32,4], index: 6, kind: input, shape index: {}]   ;;  %s1561_s7 = inlined_call_operand.vmem [shape: f32[1,4], index: 7, kind: input, shape index: {}]   ;;  %s1562_s10 = inlined_call_operand.vmem [shape: f32[64,4], index: 10, kind: output, shape index: {0}]   ;;  %s1563_s11 = inlined_call_operand.vmem [shape: f32[8,32], index: 11, kind: output, shape index: {1}]   ;;  %s1564_s12 = inlined_call_operand.vmem [shape: f32[8,32], index: 12, kind: output, shape index: {2}]  }
   0x1   :  { %v51_v0 = vld [vmem:[%s1552_s1 + $0x8] sm:$0xff]  ;;  %v50_v1 = vld [vmem:[%s1552_s1] sm:$0xff]  ;;  %v137_v3 = vld [vmem:[%s1554_s3 + $0x38] sm:$0xff] }
   0x2   :  { %95 = vmatpush.msra.mxu0 %v51_v0  ;;  %v42_v2 = vld [vmem:[%s1553_s0] sm:$0xff]  ;;  %v136_v4 = vld [vmem:[%s1554_s3 + $0x30] sm:$0xff]  ;;  %175 = vmatpush.msra.mxu1 %v137_v3  ;;  %v1223_v5 = vld [vmem:[%s1555_s4 + $0x18] sm:$0xff] }
   0x3   :  { %v1228_v6 = vld [vmem:[%s1555_s4 + $0x10] sm:$0xff]  ;;  %v135_v7 = vld [vmem:[%s1554_s3 + $0x28] sm:$0xff]  ;;  %226 = vmatpush.msra.mxu2 %v1223_v5  ;;  %v134_v9 = vld [vmem:[%s1554_s3 + $0x20] sm:$0xff]  ;;  %293 = vmatpush.msra.mxu3 %v1223_v5 }
   0x4   :  { %96 = vmatpush.msra.mxu0 %v50_v1  ;;  %176 = vmatpush.msra.mxu1 %v136_v4  ;;  %v1238_v8 = vld [vmem:[%s1555_s4 + $0x8] sm:$0xff]  ;;  %v133_v10 = vld [vmem:[%s1554_s3 + $0x18] sm:$0xff]  ;;  %v132_v11 = vld [vmem:[%s1554_s3 + $0x10] sm:$0xff] }
   0x5   :  { %991 = vmatmul.msk.f32.vlgmr.msra.gmra.mxu0 %vm56_vm0, %v42_v2  ;;  %227 = vmatpush.msra.mxu2 %v1228_v6  ;;  %v1257_v12 = vld [vmem:[%s1555_s4] sm:$0xff]  ;;  %v131_v14 = vld [vmem:[%s1554_s3 + $0x8] sm:$0xff] }
   0x6   :  { %177 = vmatpush.msra.mxu1 %v135_v7  ;;  %294 = vmatpush.msra.mxu3 %v1228_v6  ;;  %v208_v13 = vld [vmem:[%s1558_s8] sm:$0xff]  ;;  %v43_v42 = vld [vmem:[%s1553_s0 + $0x8] sm:$0xff] }
   0x7   :  { %228 = vmatpush.msra.mxu2 %v1238_v8  ;;  %v130_v15 = vld [vmem:[%s1554_s3] sm:$0xff] }
   0x8   :  { %178 = vmatpush.msra.mxu1 %v134_v9  ;;  %295 = vmatpush.msra.mxu3 %v1238_v8  ;;  %v1286_v16 = vld [vmem:[%s1556_s2] ss:$0 sm:$0xff]  ;;  %s1137_s2 = smov 32  }
   0x9   :  { %229 = vmatpush.msra.mxu2 %v1257_v12  ;;  %v1293_v20 = vld [vmem:[%s1557_s5] ss:$0 sm:$0xff] }
   0xa   :  { %179 = vmatpush.msra.mxu1 %v133_v10  ;;  %1007 = vmatmul.msk.f32.vlgmr.msra.gmra.mxu2 %vm210_vm1, %v208_v13  ;;  %v209_v26 = vld [vmem:[%s1559_s9] sm:$0xff] }
   0xb   :  { %296 = vmatpush.msra.mxu3 %v1257_v12  ;;  %356 = vmatpush.msrb.mxu2 %v1223_v5 }
   0xc   :  { %180 = vmatpush.msra.mxu1 %v132_v11 }
   0xd   :  { %419 = vmatpush.msrb.mxu3 %v1223_v5  ;;  %357 = vmatpush.msrb.mxu2 %v1228_v6 }
   0xe   :  { %181 = vmatpush.msra.mxu1 %v131_v14  ;;  %992 = vmatmul.msk.f32.gmra.mxu0 %vm56_vm0, %v43_v42  ;;  %v44_v14 = vld [vmem:[%s1553_s0 + $0x10] sm:$0xff] }
   0xf   :  { %420 = vmatpush.msrb.mxu3 %v1228_v6  ;;  %358 = vmatpush.msrb.mxu2 %v1238_v8 }
  0x10   :  { %182 = vmatpush.msra.mxu1 %v130_v15 }
  0x11   :  { %421 = vmatpush.msrb.mxu3 %v1238_v8  ;;  %359 = vmatpush.msrb.mxu2 %v1257_v12 }
  0x13   :  { %422 = vmatpush.msrb.mxu3 %v1257_v12  ;;  %482 = vmatpush.msra.mxu2 %v1223_v5 }
  0x15   :  { %483 = vmatpush.msra.mxu2 %v1228_v6 }
  0x16   :  { %993 = vmatmul.msk.f32.gmra.mxu0 %vm56_vm0, %v44_v14 }
  0x17   :  { %484 = vmatpush.msra.mxu2 %v1238_v8 }
  0x19   :  { %485 = vmatpush.msra.mxu2 %v1257_v12 }
  0x82   :  { %v98_v17 = vpop.f32.mrf.mxu0 }
  0x83   :  { %v99_v18 = vadd.f32 %v1286_v16, %v98_v17 }
  0x85   :  { %v122_v19 = vmax.f32 %v99_v18, 0.0 }
  0x87   :  { %999 = vmatmul.msk.f32.vlgmr.msra.gmra.mxu1 %vm142_vm2, %v122_v19 }
  0x8b   :  { %v101_v48 = vpop.f32.mrf.mxu0 }
  0x8c   :  { %v102_v49 = vadd.f32 %v1286_v16, %v101_v48 }
  0x8d   :  { %v231_v22 = vpop.f32.mrf.mxu2 }
  0x8e   :  { %v123_v50 = vmax.f32 %v102_v49, 0.0 }
  0x90   :  { %1000 = vmatmul.msk.f32.gmra.mxu1 %vm142_vm2, %v123_v50 }
 0x104   :  { %v184_v21 = vpop.f32.mrf.mxu1 }
 0x105   :  { %v185_v23 = vadd.f32 %v1293_v20, %v184_v21  ;;  %v104_v21 = vpop.f32.mrf.mxu0 }
 0x107   :  { %v234_v24 = vadd.f32 %v231_v22, %v185_v23  ;;  %v105_v22 = vadd.f32 %v1286_v16, %v104_v21 }
 0x109   :  { %1041 = vtanh.f32 %v234_v24  ;;  %v1008_v27 = vmul.f32 -1.442695, %v234_v24  ;;  %v124_v23 = vmax.f32 %v105_v22, 0.0 }
 0x10b   :  { %1043 = vpow2.f32 %v1008_v27  ;;  %1001 = vmatmul.msk.f32.gmra.mxu1 %vm142_vm2, %v124_v23 }
 0x10d   :  { %v187_v54 = vpop.f32.mrf.mxu1 }
 0x10e   :  { %v188_v55 = vadd.f32 %v1293_v20, %v187_v54 }
 0x10f   :  { %v1042_v25 = vpop.eup %1041 }
 0x110   :  { %261 = vrot.lane.b32.xlu0 %v1042_v25, %s1137_s2 }
 0x111   :  { %v1044_v28 = vpop.eup %1043 }
 0x112   :  { %v238_v29 = vadd.f32 1.0, %v1044_v28 }
 0x114   :  { %1045 = vrcp.f32 %v238_v29  ;;  %v250_v35 = vand.u32 2147483648, %v238_v29  ;;  %vm244_vm4 = vweird.f32 %v238_v29  ;;  %v248_v36 = vand.u32 2147483647, %v238_v29 }
 0x116   :  { %v251_v38 = vor.u32 1.1754944e-38, %v250_v35  ;;  %vm249_vm6 = vcmp.eq.f32.partialorder %v248_v36, 8.507059e+37 }
 0x118   :  { %256 = vrot.lane.b32.xlu0 %v209_v26, %s1137_s2 }
 0x11a   :  { %v1046_v30 = vpop.eup %1045 }
 0x11b   :  { %v240_v31 = vmul.f32 %v1046_v30, %v238_v29  ;;  %vm245_vm3 = vweird.f32 %v1046_v30 }
 0x11c   :  { %vm246_vm5 = vmor %vm244_vm4, %vm245_vm3 }
 0x11d   :  { %v241_v32 = vsub.f32 1.0, %v240_v31 }
 0x11f   :  { %v242_v33 = vmul.f32 %v1046_v30, %v241_v32 }
 0x121   :  { %v243_v34 = vadd.f32 %v1046_v30, %v242_v33 }
 0x123   :  { %v247_v37 = vsel %vm246_vm5, %v1046_v30, %v243_v34 }
 0x124   :  { %v252_v40 = vsel %vm249_vm6, %v251_v38, %v247_v37 }
 0x182   :  { %v262_v39 = vpop.permute.xlu0 %261 }
 0x183   :  { %v264_v41 = vmul.f32 %v262_v39, %v252_v40 }
 0x185   :  { %266 = vrot.lane.b32.xlu1 %v264_v41, %s1137_s2 }
 0x188   :  { %v190_v27 = vpop.f32.mrf.mxu1 }
 0x189   :  { %v191_v28 = vadd.f32 %v1293_v20, %v190_v27 }
 0x18a   :  { %v257_v43 = vpop.permute.xlu0 %256 }
 0x18b   :  { %v259_v44 = vmul.f32 %v257_v43, %v252_v40 }
 0x1f7   :  { %v267_v45 = vpop.permute.xlu1 %266 }
 0x1f8   :  { %v269_v46 = vadd.f32 %v267_v45, %v259_v44 }
 0x1fa   :  { %1047 = vtanh.f32 %v269_v46 }
 0x200   :  { %v1048_v47 = vpop.eup %1047 }
 0x201   :  { %272 = vrot.lane.b32.xlu1 %v1048_v47, %s1137_s2  ;;  %v45_v47 = vld [vmem:[%s1553_s0 + $0x18] sm:$0xff] }
 0x202   :  { %994 = vmatmul.msk.f32.gmra.mxu0 %vm56_vm0, %v45_v47 }
 0x273   :  { %v273_v51 = vpop.permute.xlu1 %272 }
 0x274   :  { %v275_v52 = vmul.f32 %v273_v51, %v252_v40 }
 0x276   :  { %277 = vrot.lane.b32.xlu2 %v275_v52, %s1138_s18 }
 0x2d0   :  { %v1310_v53 = vpop.permute.xlu2 %277 }
 0x2d1   :  { %1009 = vmatmul.msk.f32.vlgmr.msra.gmra.mxu3 %vm210_vm1, %v1310_v53 }
 0x2d2   :  { %545 = vmatpush.msra.mxu3 %v1223_v5 }
 0x2d4   :  { %546 = vmatpush.msra.mxu3 %v1228_v6 }
 0x2d6   :  { %547 = vmatpush.msra.mxu3 %v1238_v8 }
 0x2d8   :  { %548 = vmatpush.msra.mxu3 %v1257_v12 }
 0x354   :  { %v298_v56 = vpop.f32.mrf.mxu3 }
 0x355   :  { %v301_v57 = vadd.f32 %v298_v56, %v188_v55  ;;  %v107_v55 = vpop.f32.mrf.mxu0 }
 0x356   :  { %v108_v56 = vadd.f32 %v1286_v16, %v107_v55 }
 0x357   :  { %1049 = vtanh.f32 %v301_v57  ;;  %v1010_v59 = vmul.f32 -1.442695, %v301_v57 }
 0x358   :  { %v125_v57 = vmax.f32 %v108_v56, 0.0 }
 0x359   :  { %1051 = vpow2.f32 %v1010_v59 }
 0x35a   :  { %1002 = vmatmul.msk.f32.gmra.mxu1 %vm142_vm2, %v125_v57 }
 0x35d   :  { %v1050_v58 = vpop.eup %1049 }
 0x35e   :  { %324 = vrot.lane.b32.xlu2 %v1050_v58, %s1137_s2 }
 0x35f   :  { %v1052_v60 = vpop.eup %1051 }
 0x360   :  { %v305_v61 = vadd.f32 1.0, %v1052_v60 }
 0x362   :  { %1053 = vrcp.f32 %v305_v61  ;;  %v317_v3 = vand.u32 2147483648, %v305_v61  ;;  %vm311_vm8 = vweird.f32 %v305_v61  ;;  %v315_v4 = vand.u32 2147483647, %v305_v61 }
 0x364   :  { %v318_v9 = vor.u32 1.1754944e-38, %v317_v3  ;;  %vm316_vm10 = vcmp.eq.f32.partialorder %v315_v4, 8.507059e+37 }
 0x368   :  { %v1054_v62 = vpop.eup %1053 }
 0x369   :  { %v307_v63 = vmul.f32 %v1054_v62, %v305_v61  ;;  %vm312_vm7 = vweird.f32 %v1054_v62 }
 0x36a   :  { %vm313_vm9 = vmor %vm311_vm8, %vm312_vm7 }
 0x36b   :  { %v308_v0 = vsub.f32 1.0, %v307_v63 }
 0x36d   :  { %v309_v1 = vmul.f32 %v1054_v62, %v308_v0 }
 0x36f   :  { %v310_v2 = vadd.f32 %v1054_v62, %v309_v1 }
 0x371   :  { %v314_v7 = vsel %vm313_vm9, %v1054_v62, %v310_v2 }
 0x372   :  { %v319_v11 = vsel %vm316_vm10, %v318_v9, %v314_v7 }
 0x373   :  { %v322_v15 = vmul.f32 %v319_v11, %v269_v46 }
 0x3b8   :  { %v325_v10 = vpop.permute.xlu2 %324 }
 0x3b9   :  { %v327_v13 = vmul.f32 %v325_v10, %v319_v11 }
 0x3bb   :  { %329 = vrot.lane.b32.xlu0 %v327_v13, %s1137_s2 }
 0x3d7   :  { %v193_v59 = vpop.f32.mrf.mxu1 }
 0x3d8   :  { %v194_v60 = vadd.f32 %v1293_v20, %v193_v59 }
 0x42d   :  { %v330_v17 = vpop.permute.xlu0 %329 }
 0x42e   :  { %v332_v18 = vadd.f32 %v330_v17, %v322_v15  ;;  %v46_v15 = vld [vmem:[%s1553_s0 + $0x20] sm:$0xff] }
 0x42f   :  { %995 = vmatmul.msk.f32.gmra.mxu0 %vm56_vm0, %v46_v15 }
 0x430   :  { %1055 = vtanh.f32 %v332_v18 }
 0x436   :  { %v1056_v19 = vpop.eup %1055 }
 0x437   :  { %335 = vrot.lane.b32.xlu1 %v1056_v19, %s1137_s2 }
 0x4a9   :  { %v336_v24 = vpop.permute.xlu1 %335 }
 0x4aa   :  { %v338_v25 = vmul.f32 %v336_v24, %v319_v11 }
 0x4ac   :  { %340 = vrot.lane.b32.xlu2 %v338_v25, %s1138_s18  ;;  %v110_v22 = vpop.f32.mrf.mxu0 }
 0x4ad   :  { %v111_v23 = vadd.f32 %v1286_v16, %v110_v22 }
 0x4af   :  { %v126_v24 = vmax.f32 %v111_v23, 0.0 }
 0x4b1   :  { %1003 = vmatmul.msk.f32.gmra.mxu1 %vm142_vm2, %v126_v24 }
 0x506   :  { %v1329_v26 = vpop.permute.xlu2 %340 }
 0x507   :  { %1011 = vmatmul.msk.f32.vlgmr.msrb.gmra.mxu2 %vm210_vm1, %v1329_v26 }
 0x508   :  { %608 = vmatpush.msrb.mxu2 %v1223_v5 }
 0x50a   :  { %609 = vmatpush.msrb.mxu2 %v1228_v6 }
 0x50c   :  { %610 = vmatpush.msrb.mxu2 %v1238_v8 }
 0x50e   :  { %611 = vmatpush.msrb.mxu2 %v1257_v12 }
 0x58a   :  { %v361_v29 = vpop.f32.mrf.mxu2 }
 0x58b   :  { %v364_v30 = vadd.f32 %v361_v29, %v191_v28  ;;  %v196_v29 = vpop.f32.mrf.mxu1 }
 0x58d   :  { %1057 = vtanh.f32 %v364_v30  ;;  %v1012_v32 = vmul.f32 -1.442695, %v364_v30  ;;  %v197_v30 = vadd.f32 %v1293_v20, %v196_v29 }
 0x58f   :  { %1059 = vpow2.f32 %v1012_v32 }
 0x593   :  { %v1058_v31 = vpop.eup %1057 }
 0x594   :  { %387 = vrot.lane.b32.xlu0 %v1058_v31, %s1137_s2 }
 0x595   :  { %v1060_v33 = vpop.eup %1059 }
 0x596   :  { %v368_v34 = vadd.f32 1.0, %v1060_v33 }
 0x598   :  { %1061 = vrcp.f32 %v368_v34  ;;  %v380_v40 = vand.u32 2147483648, %v368_v34  ;;  %vm374_vm12 = vweird.f32 %v368_v34  ;;  %v378_v41 = vand.u32 2147483647, %v368_v34 }
 0x59a   :  { %v381_v43 = vor.u32 1.1754944e-38, %v380_v40  ;;  %vm379_vm14 = vcmp.eq.f32.partialorder %v378_v41, 8.507059e+37 }
 0x59e   :  { %v1062_v35 = vpop.eup %1061 }
 0x59f   :  { %v370_v36 = vmul.f32 %v1062_v35, %v368_v34  ;;  %vm375_vm11 = vweird.f32 %v1062_v35 }
 0x5a0   :  { %vm376_vm13 = vmor %vm374_vm12, %vm375_vm11 }
 0x5a1   :  { %v371_v37 = vsub.f32 1.0, %v370_v36 }
 0x5a3   :  { %v372_v38 = vmul.f32 %v1062_v35, %v371_v37 }
 0x5a5   :  { %v373_v39 = vadd.f32 %v1062_v35, %v372_v38 }
 0x5a7   :  { %v377_v42 = vsel %vm376_vm13, %v1062_v35, %v373_v39 }
 0x5a8   :  { %v382_v45 = vsel %vm379_vm14, %v381_v43, %v377_v42 }
 0x5a9   :  { %v385_v48 = vmul.f32 %v382_v45, %v332_v18 }
 0x606   :  { %v388_v44 = vpop.permute.xlu0 %387 }
 0x607   :  { %v390_v46 = vmul.f32 %v388_v44, %v382_v45 }
 0x609   :  { %392 = vrot.lane.b32.xlu1 %v390_v46, %s1137_s2 }
 0x67b   :  { %v393_v49 = vpop.permute.xlu1 %392 }
 0x67c   :  { %v395_v50 = vadd.f32 %v393_v49, %v385_v48  ;;  %v47_v49 = vld [vmem:[%s1553_s0 + $0x28] sm:$0xff] }
 0x67d   :  { %996 = vmatmul.msk.f32.gmra.mxu0 %vm56_vm0, %v47_v49 }
 0x67e   :  { %1063 = vtanh.f32 %v395_v50 }
 0x684   :  { %v1064_v51 = vpop.eup %1063 }
 0x685   :  { %398 = vrot.lane.b32.xlu2 %v1064_v51, %s1137_s2 }
 0x6df   :  { %v399_v52 = vpop.permute.xlu2 %398 }
 0x6e0   :  { %v401_v54 = vmul.f32 %v399_v52, %v382_v45 }
 0x6e2   :  { %403 = vrot.lane.b32.xlu0 %v401_v54, %s1138_s18 }
 0x6fa   :  { %v113_v55 = vpop.f32.mrf.mxu0 }
 0x6fb   :  { %v114_v56 = vadd.f32 %v1286_v16, %v113_v55 }
 0x6fd   :  { %v127_v57 = vmax.f32 %v114_v56, 0.0 }
 0x6ff   :  { %1004 = vmatmul.msk.f32.gmra.mxu1 %vm142_vm2, %v127_v57 }
 0x754   :  { %v1348_v58 = vpop.permute.xlu0 %403 }
 0x755   :  { %1013 = vmatmul.msk.f32.vlgmr.msrb.gmra.mxu3 %vm210_vm1, %v1348_v58 }
 0x756   :  { %671 = vmatpush.msrb.mxu3 %v1223_v5 }
 0x758   :  { %672 = vmatpush.msrb.mxu3 %v1228_v6 }
 0x75a   :  { %673 = vmatpush.msrb.mxu3 %v1238_v8 }
 0x75c   :  { %674 = vmatpush.msrb.mxu3 %v1257_v12 }
 0x7d8   :  { %v424_v61 = vpop.f32.mrf.mxu3 }
 0x7d9   :  { %v427_v62 = vadd.f32 %v424_v61, %v194_v60 }
 0x7db   :  { %1065 = vtanh.f32 %v427_v62  ;;  %v1014_v0 = vmul.f32 -1.442695, %v427_v62  ;;  %v199_v62 = vpop.f32.mrf.mxu1 }
 0x7dd   :  { %1067 = vpow2.f32 %v1014_v0 }
 0x7e1   :  { %v1066_v63 = vpop.eup %1065 }
 0x7e2   :  { %450 = vrot.lane.b32.xlu1 %v1066_v63, %s1137_s2  ;;  %v200_v63 = vadd.f32 %v1293_v20, %v199_v62 }
 0x7e3   :  { %v1068_v1 = vpop.eup %1067 }
 0x7e4   :  { %v431_v2 = vadd.f32 1.0, %v1068_v1 }
 0x7e6   :  { %1069 = vrcp.f32 %v431_v2  ;;  %v443_v12 = vand.u32 2147483648, %v431_v2  ;;  %vm437_vm3 = vweird.f32 %v431_v2  ;;  %v441_v7 = vand.u32 2147483647, %v431_v2 }
 0x7e8   :  { %v444_v10 = vor.u32 1.1754944e-38, %v443_v12  ;;  %vm442_vm5 = vcmp.eq.f32.partialorder %v441_v7, 8.507059e+37 }
 0x7ec   :  { %v1070_v5 = vpop.eup %1069 }
 0x7ed   :  { %v433_v6 = vmul.f32 %v1070_v5, %v431_v2  ;;  %vm438_vm15 = vweird.f32 %v1070_v5 }
 0x7ee   :  { %vm439_vm4 = vmor %vm437_vm3, %vm438_vm15 }
 0x7ef   :  { %v434_v3 = vsub.f32 1.0, %v433_v6 }
 0x7f1   :  { %v435_v8 = vmul.f32 %v1070_v5, %v434_v3 }
 0x7f3   :  { %v436_v4 = vadd.f32 %v1070_v5, %v435_v8 }
 0x7f5   :  { %v440_v9 = vsel %vm439_vm4, %v1070_v5, %v436_v4 }
 0x7f6   :  { %v445_v13 = vsel %vm442_vm5, %v444_v10, %v440_v9 }
 0x7f7   :  { %v448_v17 = vmul.f32 %v445_v13, %v395_v50 }
 0x854   :  { %v451_v11 = vpop.permute.xlu1 %450 }
 0x855   :  { %v453_v14 = vmul.f32 %v451_v11, %v445_v13 }
 0x857   :  { %455 = vrot.lane.b32.xlu2 %v453_v14, %s1137_s2 }
 0x8b1   :  { %v456_v18 = vpop.permute.xlu2 %455 }
 0x8b2   :  { %v458_v19 = vadd.f32 %v456_v18, %v448_v17 }
 0x8b4   :  { %1071 = vtanh.f32 %v458_v19 }
 0x8ba   :  { %v1072_v21 = vpop.eup %1071 }
 0x8bb   :  { %461 = vrot.lane.b32.xlu0 %v1072_v21, %s1137_s2 }
 0x92d   :  { %v462_v25 = vpop.permute.xlu0 %461 }
 0x92e   :  { %v464_v27 = vmul.f32 %v462_v25, %v445_v13 }
 0x930   :  { %466 = vrot.lane.b32.xlu1 %v464_v27, %s1138_s18 }
 0x9a2   :  { %v1367_v28 = vpop.permute.xlu1 %466 }
 0x9a3   :  { %1015 = vmatmul.msk.f32.vlgmr.msra.gmra.mxu2 %vm210_vm1, %v1367_v28 }
 0xa26   :  { %v487_v31 = vpop.f32.mrf.mxu2 }
 0xa27   :  { %v490_v32 = vadd.f32 %v487_v31, %v197_v30 }
 0xa29   :  { %1073 = vtanh.f32 %v490_v32  ;;  %v1016_v34 = vmul.f32 -1.442695, %v490_v32  ;;  %v730_v32 = vld [vmem:[%s1560_s6 + $0x18] sm:$0xff] }
 0xa2a   :  { %749 = vmatpush.msra.mxu2 %v730_v32 }
 0xa2b   :  { %1075 = vpow2.f32 %v1016_v34  ;;  %v728_v34 = vld [vmem:[%s1560_s6 + $0x8] sm:$0xff] }
 0xa2f   :  { %v1074_v33 = vpop.eup %1073 }
 0xa30   :  { %513 = vrot.lane.b32.xlu2 %v1074_v33, %s1137_s2  ;;  %v729_v33 = vld [vmem:[%s1560_s6 + $0x10] sm:$0xff] }
 0xa31   :  { %v1076_v35 = vpop.eup %1075  ;;  %750 = vmatpush.msra.mxu2 %v729_v33 }
 0xa32   :  { %v494_v36 = vadd.f32 1.0, %v1076_v35  ;;  %v727_v35 = vld [vmem:[%s1560_s6] sm:$0xff] }
 0xa33   :  { %751 = vmatpush.msra.mxu2 %v728_v34 }
 0xa34   :  { %1077 = vrcp.f32 %v494_v36  ;;  %v506_v42 = vand.u32 2147483648, %v494_v36  ;;  %vm500_vm7 = vweird.f32 %v494_v36  ;;  %v504_v43 = vand.u32 2147483647, %v494_v36 }
 0xa35   :  { %752 = vmatpush.msra.mxu2 %v727_v35 }
 0xa36   :  { %v507_v45 = vor.u32 1.1754944e-38, %v506_v42  ;;  %vm505_vm9 = vcmp.eq.f32.partialorder %v504_v43, 8.507059e+37 }
 0xa3a   :  { %v1078_v37 = vpop.eup %1077 }
 0xa3b   :  { %v496_v38 = vmul.f32 %v1078_v37, %v494_v36  ;;  %vm501_vm6 = vweird.f32 %v1078_v37 }
 0xa3c   :  { %vm502_vm8 = vmor %vm500_vm7, %vm501_vm6  ;;  %vm778_vm7 = vcmask 31744  }
 0xa3d   :  { %v497_v39 = vsub.f32 1.0, %v496_v38 }
 0xa3f   :  { %v498_v40 = vmul.f32 %v1078_v37, %v497_v39 }
 0xa41   :  { %v499_v41 = vadd.f32 %v1078_v37, %v498_v40 }
 0xa43   :  { %v503_v44 = vsel %vm502_vm8, %v1078_v37, %v499_v41 }
 0xa44   :  { %v508_v47 = vsel %vm505_vm9, %v507_v45, %v503_v44 }
 0xa45   :  { %v511_v50 = vmul.f32 %v508_v47, %v458_v19  ;;  %v48_v19 = vld [vmem:[%s1553_s0 + $0x30] sm:$0xff] }
 0xa46   :  { %997 = vmatmul.msk.f32.gmra.mxu0 %vm56_vm0, %v48_v19 }
 0xa8a   :  { %v514_v46 = vpop.permute.xlu2 %513 }
 0xa8b   :  { %v516_v48 = vmul.f32 %v514_v46, %v508_v47 }
 0xa8d   :  { %518 = vrot.lane.b32.xlu0 %v516_v48, %s1137_s2 }
 0xac3   :  { %v116_v29 = vpop.f32.mrf.mxu0 }
 0xac4   :  { %v117_v30 = vadd.f32 %v1286_v16, %v116_v29 }
 0xac6   :  { %v128_v31 = vmax.f32 %v117_v30, 0.0 }
 0xac8   :  { %1005 = vmatmul.msk.f32.gmra.mxu1 %vm142_vm2, %v128_v31 }
 0xaff   :  { %v519_v51 = vpop.permute.xlu0 %518 }
 0xb00   :  { %v521_v52 = vadd.f32 %v519_v51, %v511_v50 }
 0xb02   :  { %1079 = vtanh.f32 %v521_v52 }
 0xb08   :  { %v1080_v54 = vpop.eup %1079 }
 0xb09   :  { %524 = vrot.lane.b32.xlu1 %v1080_v54, %s1137_s2  ;;  %v49_v54 = vld [vmem:[%s1553_s0 + $0x38] sm:$0xff] }
 0xb0a   :  { %998 = vmatmul.msk.f32.gmra.mxu0 %vm56_vm0, %v49_v54 }
 0xb45   :  { %v202_v37 = vpop.f32.mrf.mxu1 }
 0xb46   :  { %v203_v38 = vadd.f32 %v1293_v20, %v202_v37 }
 0xb7b   :  { %v525_v59 = vpop.permute.xlu1 %524 }
 0xb7c   :  { %v527_v60 = vmul.f32 %v525_v59, %v508_v47 }
 0xb7e   :  { %529 = vrot.lane.b32.xlu2 %v527_v60, %s1138_s18 }
 0xb87   :  { %v119_v60 = vpop.f32.mrf.mxu0 }
 0xbd8   :  { %v1382_v61 = vpop.permute.xlu2 %529 }
 0xbd9   :  { %1017 = vmatmul.msk.f32.vlgmr.msra.gmra.mxu3 %vm210_vm1, %v1382_v61 }
 0xbda   :  { %1031 = vmatpush.msra.mxu3 %v730_v32 }
 0xbdc   :  { %1032 = vmatpush.msra.mxu3 %v729_v33 }
 0xbde   :  { %1033 = vmatpush.msra.mxu3 %v728_v34 }
 0xbe0   :  { %1034 = vmatpush.msra.mxu3 %v727_v35 }
 0xc5c   :  { %v550_v0 = vpop.f32.mrf.mxu3 }
 0xc5d   :  { %v553_v1 = vadd.f32 %v550_v0, %v200_v63 }
 0xc5f   :  { %1081 = vtanh.f32 %v553_v1  ;;  %v1018_v5 = vmul.f32 -1.442695, %v553_v1 }
 0xc61   :  { %1083 = vpow2.f32 %v1018_v5 }
 0xc65   :  { %v1082_v2 = vpop.eup %1081 }
 0xc66   :  { %576 = vrot.lane.b32.xlu0 %v1082_v2, %s1137_s2 }
 0xc67   :  { %v1084_v6 = vpop.eup %1083 }
 0xc68   :  { %v557_v3 = vadd.f32 1.0, %v1084_v6 }
 0xc6a   :  { %1085 = vrcp.f32 %v557_v3  ;;  %v569_v10 = vand.u32 2147483648, %v557_v3  ;;  %vm563_vm11 = vweird.f32 %v557_v3  ;;  %v567_v11 = vand.u32 2147483647, %v557_v3 }
 0xc6c   :  { %v570_v14 = vor.u32 1.1754944e-38, %v569_v10  ;;  %vm568_vm13 = vcmp.eq.f32.partialorder %v567_v11, 8.507059e+37 }
 0xc70   :  { %v1086_v8 = vpop.eup %1085 }
 0xc71   :  { %v559_v4 = vmul.f32 %v1086_v8, %v557_v3  ;;  %vm564_vm10 = vweird.f32 %v1086_v8 }
 0xc72   :  { %vm565_vm12 = vmor %vm563_vm11, %vm564_vm10 }
 0xc73   :  { %v560_v12 = vsub.f32 1.0, %v559_v4 }
 0xc75   :  { %v561_v7 = vmul.f32 %v1086_v8, %v560_v12 }
 0xc77   :  { %v562_v9 = vadd.f32 %v1086_v8, %v561_v7 }
 0xc79   :  { %v566_v13 = vsel %vm565_vm12, %v1086_v8, %v562_v9 }
 0xc7a   :  { %v571_v17 = vsel %vm568_vm13, %v570_v14, %v566_v13 }
 0xc7b   :  { %v574_v21 = vmul.f32 %v571_v17, %v521_v52 }
 0xcd8   :  { %v577_v15 = vpop.permute.xlu0 %576 }
 0xcd9   :  { %v579_v18 = vmul.f32 %v577_v15, %v571_v17 }
 0xcdb   :  { %581 = vrot.lane.b32.xlu1 %v579_v18, %s1137_s2 }
 0xd4d   :  { %v582_v22 = vpop.permute.xlu1 %581 }
 0xd4e   :  { %v1393_v23 = vadd.f32 %v582_v22, %v574_v21 }
 0xd50   :  { %1087 = vtanh.f32 %v1393_v23 }
 0xd56   :  { %v1088_v24 = vpop.eup %1087 }
 0xd57   :  { %587 = vrot.lane.b32.xlu2 %v1088_v24, %s1137_s2 }
 0xdb1   :  { %v588_v25 = vpop.permute.xlu2 %587 }
 0xdb2   :  { %v590_v27 = vmul.f32 %v588_v25, %v571_v17 }
 0xdb4   :  { %592 = vrot.lane.b32.xlu0 %v590_v27, %s1138_s18  ;;  %v1444_v27 = vld [vmem:[%s1561_s7] ss:$0 sm:$0xff] }
 0xe26   :  { %v593_v36 = vpop.permute.xlu0 %592 }
 0xe27   :  { %1019 = vmatmul.msk.f32.vlgmr.msrb.gmra.mxu2 %vm210_vm1, %v593_v36 }
 0xe2f   :  { %1023 = vmatmul.msk.f32.vlgmr.msra.gmra.mxu2 %vm210_vm1, %v1310_v53 }
 0xe37   :  { %1024 = vmatmul.msk.f32.gmra.mxu2 %vm210_vm1, %v1329_v26 }
 0xe3f   :  { %1025 = vmatmul.msk.f32.gmra.mxu2 %vm210_vm1, %v1348_v58 }
 0xe47   :  { %1026 = vmatmul.msk.f32.gmra.mxu2 %vm210_vm1, %v1367_v28 }
 0xe4f   :  { %1027 = vmatmul.msk.f32.gmra.mxu2 %vm210_vm1, %v1382_v61  ;;  %v120_v61 = vadd.f32 %v1286_v16, %v119_v60 }
 0xe51   :  { %v129_v62 = vmax.f32 %v120_v61, 0.0 }
 0xe53   :  { %1006 = vmatmul.msk.f32.gmra.mxu1 %vm142_vm2, %v129_v62 }
 0xeaa   :  { %v613_v39 = vpop.f32.mrf.mxu2 }
 0xeab   :  { %v616_v40 = vadd.f32 %v613_v39, %v203_v38 }
 0xead   :  { %1089 = vtanh.f32 %v616_v40  ;;  %v1020_v53 = vmul.f32 -1.442695, %v616_v40 }
 0xeaf   :  { %1091 = vpow2.f32 %v1020_v53 }
 0xeb2   :  { %v754_v22 = vpop.f32.mrf.mxu2 }
 0xeb3   :  { %v1090_v41 = vpop.eup %1089  ;;  %v755_v29 = vadd.f32 %v1444_v27, %v754_v22 }
 0xeb4   :  { %639 = vrot.lane.b32.xlu1 %v1090_v41, %s1137_s2 }
 0xeb5   :  { %v1092_v26 = vpop.eup %1091  ;;  %v779_v30 = vsel %vm778_vm7, %v755_v29, -inf }
 0xeb6   :  { %v620_v42 = vadd.f32 1.0, %v1092_v26 }
 0xeb8   :  { %1093 = vrcp.f32 %v620_v42  ;;  %v632_v46 = vand.u32 2147483648, %v620_v42  ;;  %vm626_vm15 = vweird.f32 %v620_v42  ;;  %v630_v47 = vand.u32 2147483647, %v620_v42 }
 0xeba   :  { %v633_v49 = vor.u32 1.1754944e-38, %v632_v46  ;;  %vm631_vm4 = vcmp.eq.f32.partialorder %v630_v47, 8.507059e+37 }
 0xebe   :  { %v1094_v58 = vpop.eup %1093 }
 0xebf   :  { %v622_v43 = vmul.f32 %v1094_v58, %v620_v42  ;;  %vm627_vm14 = vweird.f32 %v1094_v58 }
 0xec0   :  { %vm628_vm3 = vmor %vm626_vm15, %vm627_vm14 }
 0xec1   :  { %v623_v28 = vsub.f32 1.0, %v622_v43 }
 0xec3   :  { %v624_v44 = vmul.f32 %v1094_v58, %v623_v28 }
 0xec5   :  { %v625_v45 = vadd.f32 %v1094_v58, %v624_v44 }
 0xec7   :  { %v629_v48 = vsel %vm628_vm3, %v1094_v58, %v625_v45 }
 0xec8   :  { %v634_v51 = vsel %vm631_vm4, %v633_v49, %v629_v48 }
 0xec9   :  { %v637_v55 = vmul.f32 %v634_v51, %v1393_v23  ;;  %v757_v23 = vpop.f32.mrf.mxu2 }
 0xeca   :  { %v758_v38 = vadd.f32 %v1444_v27, %v757_v23 }
 0xecc   :  { %v782_v41 = vsel %vm778_vm7, %v758_v38, -inf }
 0xed0   :  { %v205_v2 = vpop.f32.mrf.mxu1 }
 0xed1   :  { %v206_v5 = vadd.f32 %v1293_v20, %v205_v2  ;;  %v760_v24 = vpop.f32.mrf.mxu2 }
 0xed2   :  { %v1464_v46 = vadd.f32 %v1444_v27, %v760_v24 }
 0xed4   :  { %v785_v48 = vsel %vm778_vm7, %v1464_v46, -inf }
 0xed9   :  { %v763_v25 = vpop.f32.mrf.mxu2 }
 0xeda   :  { %v764_v49 = vadd.f32 %v1444_v27, %v763_v25 }
 0xee1   :  { %v766_v31 = vpop.f32.mrf.mxu2 }
 0xee2   :  { %v767_v32 = vadd.f32 %v1444_v27, %v766_v31 }
 0xee4   :  { %v791_v33 = vsel %vm778_vm7, %v767_v32, -inf }
 0xf26   :  { %v640_v50 = vpop.permute.xlu1 %639 }
 0xf27   :  { %v642_v52 = vmul.f32 %v640_v50, %v634_v51 }
 0xf29   :  { %644 = vrot.lane.b32.xlu2 %v642_v52, %s1137_s2  ;;  %v788_v52 = vsel %vm778_vm7, %v764_v49, -inf }
 0xf83   :  { %v645_v56 = vpop.permute.xlu2 %644 }
 0xf84   :  { %v647_v57 = vadd.f32 %v645_v56, %v637_v55 }
 0xf86   :  { %1095 = vtanh.f32 %v647_v57 }
 0xf8c   :  { %v1096_v59 = vpop.eup %1095 }
 0xf8d   :  { %650 = vrot.lane.b32.xlu0 %v1096_v59, %s1137_s2 }
 0xfff   :  { %v651_v63 = vpop.permute.xlu0 %650 }
0x1000   :  { %v653_v0 = vmul.f32 %v651_v63, %v634_v51 }
0x1002   :  { %655 = vrot.lane.b32.xlu1 %v653_v0, %s1138_s18 }
0x1074   :  { %v656_v1 = vpop.permute.xlu1 %655 }
0x1075   :  { %1021 = vmatmul.msk.f32.vlgmr.msrb.gmra.mxu3 %vm210_vm1, %v656_v1 }
0x107d   :  { %1028 = vmatmul.msk.f32.vlgmr.msra.gmra.mxu3 %vm210_vm1, %v593_v36 }
0x1085   :  { %1029 = vmatmul.msk.f32.gmra.mxu3 %vm210_vm1, %v656_v1 }
0x10f8   :  { %v676_v6 = vpop.f32.mrf.mxu3 }
0x10f9   :  { %v679_v3 = vadd.f32 %v676_v6, %v206_v5 }
0x10fb   :  { %1097 = vtanh.f32 %v679_v3  ;;  %v1022_v8 = vmul.f32 -1.442695, %v679_v3 }
0x10fd   :  { %1099 = vpow2.f32 %v1022_v8 }
0x1100   :  { %v769_v53 = vpop.f32.mrf.mxu3 }
0x1101   :  { %v1098_v16 = vpop.eup %1097  ;;  %v1457_v42 = vadd.f32 %v1444_v27, %v769_v53 }
0x1102   :  { %702 = vrot.lane.b32.xlu2 %v1098_v16, %s1137_s2 }
0x1103   :  { %v1100_v4 = vpop.eup %1099  ;;  %v794_v58 = vsel %vm778_vm7, %v1457_v42, -inf }
0x1104   :  { %v683_v12 = vadd.f32 1.0, %v1100_v4 }
0x1106   :  { %1101 = vrcp.f32 %v683_v12  ;;  %v695_v14 = vand.u32 2147483648, %v683_v12  ;;  %vm689_vm2 = vweird.f32 %v683_v12  ;;  %v693_v20 = vand.u32 2147483647, %v683_v12 }
0x1108   :  { %v696_v17 = vor.u32 1.1754944e-38, %v695_v14  ;;  %vm694_vm6 = vcmp.eq.f32.partialorder %v693_v20, 8.507059e+37  ;;  %v772_v54 = vpop.f32.mrf.mxu3 }
0x1109   :  { %v773_v56 = vadd.f32 %v1444_v27, %v772_v54 }
0x110b   :  { %v797_v61 = vsel %vm778_vm7, %v773_v56, -inf }
0x110c   :  { %v1102_v7 = vpop.eup %1101 }
0x110d   :  { %v685_v9 = vmul.f32 %v1102_v7, %v683_v12  ;;  %vm690_vm0 = vweird.f32 %v1102_v7 }
0x110e   :  { %vm691_vm5 = vmor %vm689_vm2, %vm690_vm0 }
0x110f   :  { %v686_v10 = vsub.f32 1.0, %v685_v9 }
0x1111   :  { %v687_v11 = vmul.f32 %v1102_v7, %v686_v10 }
0x1113   :  { %v688_v13 = vadd.f32 %v1102_v7, %v687_v11 }
0x1115   :  { %v692_v15 = vsel %vm691_vm5, %v1102_v7, %v688_v13 }
0x1116   :  { %v697_v19 = vsel %vm694_vm6, %v696_v17, %v692_v15 }
0x1117   :  { %v700_v34 = vmul.f32 %v697_v19, %v647_v57 }
0x115c   :  { %v703_v18 = vpop.permute.xlu2 %702 }
0x115d   :  { %v705_v21 = vmul.f32 %v703_v18, %v697_v19 }
0x115f   :  { %707 = vrot.lane.b32.xlu0 %v705_v21, %s1137_s2 }
0x1189   :  { %780 = vmax.xlane.f32.xlu0 %v779_v30 }
0x1191   :  { %792 = vmax.xlane.f32.xlu0 %v791_v33 }
0x11d1   :  { %v708_v35 = vpop.permute.xlu0 %707 }
0x11d2   :  { %v1450_v36 = vadd.f32 %v708_v35, %v700_v34 }
0x11d4   :  { %1103 = vtanh.f32 %v1450_v36 }
0x11da   :  { %v1104_v37 = vpop.eup %1103 }
0x11db   :  { %713 = vrot.lane.b32.xlu1 %v1104_v37, %s1137_s2 }
0x11fc   :  { %v781_v39 = vpop.xlane.xlu0 %780 }
0x11fd   :  { %v803_v40 = vsub.f32 %v755_v29, %v781_v39 }
0x11ff   :  { %v811_v26 = vmul.f32 1.442695, %v803_v40 }
0x1201   :  { %1105 = vpow2.f32 %v811_v26 }
0x1204   :  { %v793_v57 = vpop.xlane.xlu0 %792 }
0x1205   :  { %783 = vmax.xlane.f32.xlu1 %v782_v41  ;;  %v807_v59 = vsub.f32 %v767_v32, %v793_v57 }
0x1207   :  { %v1106_v43 = vpop.eup %1105  ;;  %v819_v62 = vmul.f32 1.442695, %v807_v59 }
0x1208   :  { %v827_v28 = vsel %vm778_vm7, %v1106_v43, 0.0 }
0x120d   :  { %795 = vmax.xlane.f32.xlu1 %v794_v58 }
0x1215   :  { %828 = vadd.xlane.f32.xlu1 %v827_v28 }
0x124d   :  { %v714_v44 = vpop.permute.xlu1 %713 }
0x124e   :  { %v716_v45 = vmul.f32 %v714_v44, %v697_v19 }
0x1250   :  { %718 = vrot.lane.b32.xlu2 %v716_v45, %s1138_s18 }
0x1278   :  { %v784_v47 = vpop.xlane.xlu1 %783 }
0x1279   :  { %786 = vmax.xlane.f32.xlu2 %v785_v48  ;;  %v804_v50 = vsub.f32 %v758_v38, %v784_v47 }
0x127b   :  { %v813_v55 = vmul.f32 1.442695, %v804_v50 }
0x127d   :  { %1107 = vpow2.f32 %v813_v55 }
0x1280   :  { %v1469_v51 = vpop.xlane.xlu1 %795 }
0x1281   :  { %789 = vmax.xlane.f32.xlu2 %v788_v52  ;;  %v808_v59 = vsub.f32 %v1457_v42, %v1469_v51 }
0x1283   :  { %v1474_v63 = vpop.eup %1107 }
0x1284   :  { %v830_v2 = vsel %vm778_vm7, %v1474_v63, 0.0 }
0x1288   :  { %v829_v60 = vpop.xlane.xlu1 %828 }
0x1289   :  { %1109 = vrcp.f32 %v829_v60  ;;  %798 = vmax.xlane.f32.xlu2 %v797_v61  ;;  %v862_v6 = vand.u32 2147483648, %v829_v60  ;;  %v860_v16 = vand.u32 2147483647, %v829_v60  ;;  %vm856_vm9 = vweird.f32 %v829_v60 }
0x128a   :  { %1111 = vpow2.f32 %v819_v62  ;;  %v821_v61 = vmul.f32 1.442695, %v808_v59 }
0x128b   :  { %v863_v12 = vor.u32 1.1754944e-38, %v862_v6  ;;  %vm861_vm11 = vcmp.eq.f32.partialorder %v860_v16, 8.507059e+37 }
0x128f   :  { %v1110_v0 = vpop.eup %1109 }
0x1290   :  { %v852_v1 = vmul.f32 %v1110_v0, %v829_v60  ;;  %vm857_vm8 = vweird.f32 %v1110_v0  ;;  %v1478_v8 = vpop.eup %1111 }
0x1291   :  { %831 = vadd.xlane.f32.xlu2 %v830_v2  ;;  %vm858_vm10 = vmor %vm856_vm9, %vm857_vm8  ;;  %v839_v9 = vsel %vm778_vm7, %v1478_v8, 0.0 }
0x1292   :  { %v853_v5 = vsub.f32 1.0, %v852_v1 }
0x1294   :  { %v854_v3 = vmul.f32 %v1110_v0, %v853_v5 }
0x1296   :  { %v855_v4 = vadd.f32 %v1110_v0, %v854_v3 }
0x1298   :  { %v859_v7 = vsel %vm858_vm10, %v1110_v0, %v855_v4 }
0x1299   :  { %v864_v10 = vsel %vm861_vm11, %v863_v12, %v859_v7  ;;  %840 = vadd.xlane.f32.xlu2 %v839_v9 }
0x129a   :  { %v865_v11 = vmul.f32 %v1106_v43, %v864_v10 }
0x129c   :  { %971 = vst.msk [vmem:[%s1562_s10] sm:$0xff] %vm778_vm7, %v865_v11 }
0x12aa   :  { %v719_v13 = vpop.permute.xlu2 %718 }
0x12ab   :  { %721 = vst.msk [vmem:[%s1563_s11] sm:$0xff] %vm210_vm1, %v719_v13  ;;  %1030 = vmatmul.msk.f32.gmra.mxu3 %vm210_vm1, %v719_v13 }
0x12ec   :  { %v787_v14 = vpop.xlane.xlu2 %786 }
0x12ed   :  { %v805_v54 = vsub.f32 %v1464_v46, %v787_v14 }
0x12ef   :  { %v815_v55 = vmul.f32 1.442695, %v805_v54 }
0x12f4   :  { %v790_v20 = vpop.xlane.xlu2 %789 }
0x12f5   :  { %v806_v15 = vsub.f32 %v764_v49, %v790_v20 }
0x12f7   :  { %v817_v17 = vmul.f32 1.442695, %v806_v15 }
0x12f9   :  { %1113 = vpow2.f32 %v817_v17 }
0x12fc   :  { %v799_v18 = vpop.xlane.xlu2 %798 }
0x12fd   :  { %v809_v19 = vsub.f32 %v773_v56, %v799_v18 }
0x12ff   :  { %v1491_v21 = vpop.eup %1113  ;;  %v823_v22 = vmul.f32 1.442695, %v809_v19 }
0x1300   :  { %v836_v23 = vsel %vm778_vm7, %v1491_v21, 0.0 }
0x1301   :  { %1115 = vpow2.f32 %v823_v22  ;;  %837 = vadd.xlane.f32.xlu1 %v836_v23 }
0x1304   :  { %v832_v24 = vpop.xlane.xlu2 %831 }
0x1305   :  { %1117 = vrcp.f32 %v832_v24  ;;  %v877_v34 = vand.u32 2147483648, %v832_v24  ;;  %v875_v37 = vand.u32 2147483647, %v832_v24  ;;  %vm871_vm13 = vweird.f32 %v832_v24 }
0x1307   :  { %v1495_v25 = vpop.eup %1115  ;;  %v878_v40 = vor.u32 1.1754944e-38, %v877_v34  ;;  %vm876_vm15 = vcmp.eq.f32.partialorder %v875_v37, 8.507059e+37 }
0x1308   :  { %v845_v29 = vsel %vm778_vm7, %v1495_v25, 0.0 }
0x1309   :  { %846 = vadd.xlane.f32.xlu1 %v845_v29 }
0x130b   :  { %v1118_v30 = vpop.eup %1117 }
0x130c   :  { %v867_v31 = vmul.f32 %v1118_v30, %v832_v24  ;;  %v841_v32 = vpop.xlane.xlu2 %840  ;;  %vm872_vm12 = vweird.f32 %v1118_v30 }
0x130d   :  { %1119 = vrcp.f32 %v841_v32  ;;  %vm873_vm14 = vmor %vm871_vm13, %vm872_vm12  ;;  %v922_v28 = vand.u32 2147483648, %v841_v32  ;;  %v920_v45 = vand.u32 2147483647, %v841_v32  ;;  %vm916_vm4 = vweird.f32 %v841_v32 }
0x130e   :  { %v868_v33 = vsub.f32 1.0, %v867_v31  ;;  %1121 = vpow2.f32 %v815_v55 }
0x130f   :  { %v923_v48 = vor.u32 1.1754944e-38, %v922_v28  ;;  %vm921_vm2 = vcmp.eq.f32.partialorder %v920_v45, 8.507059e+37  ;;  %1123 = vpow2.f32 %v821_v61 }
0x1310   :  { %v869_v35 = vmul.f32 %v1118_v30, %v868_v33 }
0x1312   :  { %v870_v38 = vadd.f32 %v1118_v30, %v869_v35 }
0x1313   :  { %v1120_v39 = vpop.eup %1119 }
0x1314   :  { %v874_v41 = vsel %vm873_vm14, %v1118_v30, %v870_v38  ;;  %v912_v53 = vmul.f32 %v1120_v39, %v841_v32  ;;  %vm917_vm3 = vweird.f32 %v1120_v39  ;;  %v1514_v62 = vpop.eup %1121 }
0x1315   :  { %v879_v26 = vsel %vm876_vm15, %v878_v40, %v874_v41  ;;  %vm918_vm0 = vmor %vm916_vm4, %vm917_vm3  ;;  %v1518_v46 = vpop.eup %1123 }
0x1316   :  { %v880_v58 = vmul.f32 %v1474_v63, %v879_v26  ;;  %v913_v43 = vsub.f32 1.0, %v912_v53  ;;  %v833_v63 = vsel %vm778_vm7, %v1514_v62, 0.0 }
0x1318   :  { %972 = vst.msk [vmem:[%s1562_s10 + $0x8] sm:$0xff] %vm778_vm7, %v880_v58  ;;  %v914_v44 = vmul.f32 %v1120_v39, %v913_v43 }
0x131a   :  { %v915_v47 = vadd.f32 %v1120_v39, %v914_v44 }
0x131c   :  { %v919_v49 = vsel %vm918_vm0, %v1120_v39, %v915_v47 }
0x131d   :  { %v924_v50 = vsel %vm921_vm2, %v923_v48, %v919_v49 }
0x131e   :  { %v925_v52 = vmul.f32 %v1478_v8, %v924_v50 }
0x1320   :  { %975 = vst.msk [vmem:[%s1562_s10 + $0x20] sm:$0xff] %vm778_vm7, %v925_v52 }
0x132e   :  { %v775_v56 = vpop.f32.mrf.mxu3 }
0x132f   :  { %v776_v57 = vadd.f32 %v1444_v27, %v775_v56  ;;  %v842_v27 = vsel %vm778_vm7, %v1518_v46, 0.0 }
0x1331   :  { %v800_v60 = vsel %vm778_vm7, %v776_v57, -inf }
0x1332   :  { %801 = vmax.xlane.f32.xlu0 %v800_v60 }
0x133a   :  { %834 = vadd.xlane.f32.xlu0 %v833_v63 }
0x1342   :  { %843 = vadd.xlane.f32.xlu0 %v842_v27 }
0x1356   :  { %723 = vrot.lane.b32.xlu0 %v1450_v36, %s1139_s20 }
0x1374   :  { %v838_v42 = vpop.xlane.xlu1 %837 }
0x1375   :  { %1125 = vrcp.f32 %v838_v42  ;;  %v907_v5 = vand.u32 2147483648, %v838_v42  ;;  %v905_v3 = vand.u32 2147483647, %v838_v42  ;;  %vm901_vm6 = vweird.f32 %v838_v42 }
0x1377   :  { %v908_v4 = vor.u32 1.1754944e-38, %v907_v5  ;;  %vm906_vm9 = vcmp.eq.f32.partialorder %v905_v3, 8.507059e+37 }
0x137b   :  { %v1126_v51 = vpop.eup %1125 }
0x137c   :  { %v897_v0 = vmul.f32 %v1126_v51, %v838_v42  ;;  %v847_v1 = vpop.xlane.xlu1 %846  ;;  %vm902_vm5 = vweird.f32 %v1126_v51 }
0x137d   :  { %1127 = vrcp.f32 %v847_v1  ;;  %vm903_vm8 = vmor %vm901_vm6, %vm902_vm5  ;;  %v952_v11 = vand.u32 2147483648, %v847_v1  ;;  %v950_v14 = vand.u32 2147483647, %v847_v1  ;;  %vm946_vm11 = vweird.f32 %v847_v1 }
0x137e   :  { %v898_v2 = vsub.f32 1.0, %v897_v0 }
0x137f   :  { %v953_v15 = vor.u32 1.1754944e-38, %v952_v11  ;;  %vm951_vm13 = vcmp.eq.f32.partialorder %v950_v14, 8.507059e+37 }
0x1380   :  { %v899_v6 = vmul.f32 %v1126_v51, %v898_v2 }
0x1382   :  { %v900_v16 = vadd.f32 %v1126_v51, %v899_v6 }
0x1383   :  { %v1128_v8 = vpop.eup %1127 }
0x1384   :  { %v904_v12 = vsel %vm903_vm8, %v1126_v51, %v900_v16  ;;  %v942_v7 = vmul.f32 %v1128_v8, %v847_v1  ;;  %vm947_vm10 = vweird.f32 %v1128_v8 }
0x1385   :  { %v909_v36 = vsel %vm906_vm9, %v908_v4, %v904_v12  ;;  %vm948_vm12 = vmor %vm946_vm11, %vm947_vm10 }
0x1386   :  { %v910_v9 = vmul.f32 %v1491_v21, %v909_v36  ;;  %v943_v10 = vsub.f32 1.0, %v942_v7 }
0x1388   :  { %974 = vst.msk [vmem:[%s1562_s10 + $0x18] sm:$0xff] %vm778_vm7, %v910_v9  ;;  %v944_v13 = vmul.f32 %v1128_v8, %v943_v10 }
0x138a   :  { %v945_v20 = vadd.f32 %v1128_v8, %v944_v13 }
0x138c   :  { %v949_v17 = vsel %vm948_vm12, %v1128_v8, %v945_v20 }
0x138d   :  { %v954_v18 = vsel %vm951_vm13, %v953_v15, %v949_v17 }
0x138e   :  { %v955_v19 = vmul.f32 %v1495_v25, %v954_v18 }
0x1390   :  { %977 = vst.msk [vmem:[%s1562_s10 + $0x30] sm:$0xff] %vm778_vm7, %v955_v19 }
0x13a5   :  { %v802_v21 = vpop.xlane.xlu0 %801 }
0x13a6   :  { %v810_v22 = vsub.f32 %v776_v57, %v802_v21 }
0x13a8   :  { %v825_v23 = vmul.f32 1.442695, %v810_v22 }
0x13aa   :  { %1129 = vpow2.f32 %v825_v23 }
0x13ad   :  { %v835_v24 = vpop.xlane.xlu0 %834 }
0x13ae   :  { %1131 = vrcp.f32 %v835_v24  ;;  %v892_v34 = vand.u32 2147483648, %v835_v24  ;;  %v890_v37 = vand.u32 2147483647, %v835_v24  ;;  %vm886_vm15 = vweird.f32 %v835_v24 }
0x13b0   :  { %v1130_v29 = vpop.eup %1129  ;;  %v893_v40 = vor.u32 1.1754944e-38, %v892_v34  ;;  %vm891_vm4 = vcmp.eq.f32.partialorder %v890_v37, 8.507059e+37 }
0x13b1   :  { %v848_v30 = vsel %vm778_vm7, %v1130_v29, 0.0 }
0x13b2   :  { %849 = vadd.xlane.f32.xlu2 %v848_v30 }
0x13b4   :  { %v1132_v31 = vpop.eup %1131 }
0x13b5   :  { %v882_v32 = vmul.f32 %v1132_v31, %v835_v24  ;;  %v844_v33 = vpop.xlane.xlu0 %843  ;;  %vm887_vm14 = vweird.f32 %v1132_v31 }
0x13b6   :  { %1133 = vrcp.f32 %v844_v33  ;;  %vm888_vm3 = vmor %vm886_vm15, %vm887_vm14  ;;  %v937_v28 = vand.u32 2147483648, %v844_v33  ;;  %v935_v45 = vand.u32 2147483647, %v844_v33  ;;  %vm931_vm2 = vweird.f32 %v844_v33 }
0x13b7   :  { %v883_v25 = vsub.f32 1.0, %v882_v32 }
0x13b8   :  { %v938_v48 = vor.u32 1.1754944e-38, %v937_v28  ;;  %vm936_vm6 = vcmp.eq.f32.partialorder %v935_v45, 8.507059e+37 }
0x13b9   :  { %v884_v35 = vmul.f32 %v1132_v31, %v883_v25 }
0x13bb   :  { %v885_v38 = vadd.f32 %v1132_v31, %v884_v35 }
0x13bc   :  { %v1134_v39 = vpop.eup %1133 }
0x13bd   :  { %v889_v41 = vsel %vm888_vm3, %v1132_v31, %v885_v38  ;;  %v927_v53 = vmul.f32 %v1134_v39, %v844_v33  ;;  %vm932_vm0 = vweird.f32 %v1134_v39 }
0x13be   :  { %v894_v26 = vsel %vm891_vm4, %v893_v40, %v889_v41  ;;  %vm933_vm5 = vmor %vm931_vm2, %vm932_vm0 }
0x13bf   :  { %v895_v58 = vmul.f32 %v1514_v62, %v894_v26  ;;  %v928_v43 = vsub.f32 1.0, %v927_v53 }
0x13c1   :  { %973 = vst.msk [vmem:[%s1562_s10 + $0x10] sm:$0xff] %vm778_vm7, %v895_v58  ;;  %v929_v44 = vmul.f32 %v1134_v39, %v928_v43 }
0x13c3   :  { %v930_v47 = vadd.f32 %v1134_v39, %v929_v44 }
0x13c5   :  { %v934_v49 = vsel %vm933_vm5, %v1134_v39, %v930_v47 }
0x13c6   :  { %v939_v50 = vsel %vm936_vm6, %v938_v48, %v934_v49 }
0x13c7   :  { %v940_v52 = vmul.f32 %v1518_v46, %v939_v50 }
0x13c8   :  { %v724_v54 = vpop.permute.xlu0 %723 }
0x13c9   :  { %976 = vst.msk [vmem:[%s1562_s10 + $0x28] sm:$0xff] %vm778_vm7, %v940_v52 }
0x13ca   :  { %726 = vst.msk [vmem:[%s1564_s12] sm:$0xff] %vm210_vm1, %v724_v54 }
0x1425   :  { %v850_v55 = vpop.xlane.xlu2 %849 }
0x1426   :  { %1135 = vrcp.f32 %v850_v55  ;;  %v967_v60 = vand.u32 2147483648, %v850_v55  ;;  %v965_v62 = vand.u32 2147483647, %v850_v55  ;;  %vm961_vm9 = vweird.f32 %v850_v55 }
0x1428   :  { %v968_v46 = vor.u32 1.1754944e-38, %v967_v60  ;;  %vm966_vm11 = vcmp.eq.f32.partialorder %v965_v62, 8.507059e+37 }
0x142c   :  { %v1136_v56 = vpop.eup %1135 }
0x142d   :  { %v957_v57 = vmul.f32 %v1136_v56, %v850_v55  ;;  %vm962_vm8 = vweird.f32 %v1136_v56 }
0x142e   :  { %vm963_vm10 = vmor %vm961_vm9, %vm962_vm8 }
0x142f   :  { %v958_v59 = vsub.f32 1.0, %v957_v57 }
0x1431   :  { %v959_v61 = vmul.f32 %v1136_v56, %v958_v59 }
0x1433   :  { %v960_v63 = vadd.f32 %v1136_v56, %v959_v61 }
0x1435   :  { %v964_v27 = vsel %vm963_vm10, %v1136_v56, %v960_v63 }
0x1436   :  { %v969_v42 = vsel %vm966_vm11, %v968_v46, %v964_v27 }
0x1437   :  { %v970_v51 = vmul.f32 %v1130_v29, %v969_v42 }
0x1439   :  { %978 = vst.msk [vmem:[%s1562_s10 + $0x38] sm:$0xff] %vm778_vm7, %v970_v51 }

</bundles_post_ra>
